<compile_context>
chip_gen: v6e
topology: v6e:2x2x1
jax: 0.10.0
libtpu: 0.0.40
codegen_flags: <defaults>
</compile_context>

<pallas_src>
import math
import functools

import jax
import jax.numpy as jnp
from jax import lax
from jax.experimental import pallas as pl
from jax.experimental.pallas import tpu as pltpu


# ----------------------------------------------------------------------------- kernel
def _attention_kernel(x_ref, wqkv_ref, wout_ref, bout_ref, o_ref, *, B, N, heads, dh):
    """out = to_out( MHSA(x) ), x flattened to (B*N, D)."""
    inner = heads * dh

    x2d = x_ref[...]                                                        # (B*N, D)

    # --- ONE fused, lane-dense QKV projection (softmax scale pre-folded into Q cols)
    qkv = jnp.dot(x2d, wqkv_ref[...],
                  preferred_element_type=jnp.float32)                      # (B*N, 3*inner)

    # Lane-aligned 128-wide slices; reshapes only split/merge *major* dims.
    q4 = qkv[:, 0 * inner:1 * inner].reshape(B, 1, N, inner)
    k4 = qkv[:, 1 * inner:2 * inner].reshape(B, 1, N, inner)
    v4 = qkv[:, 2 * inner:3 * inner].reshape(B, 1, N, inner)

    # Head-selection mask: mask[0, h, 0, c] = 1.0 iff column c belongs to head h.
    col = lax.broadcasted_iota(jnp.int32, (1, heads, 1, inner), 3)
    hid = lax.broadcasted_iota(jnp.int32, (1, heads, 1, inner), 1)
    mask = jnp.logical_and(col >= hid * dh, col < (hid + 1) * dh).astype(jnp.float32)

    # --- scores for ALL (batch, head) pairs in one batched contraction.
    #     K is head-masked, so contracting over the full inner dim reproduces the
    #     per-head q_h . k_h^T exactly (off-head terms are multiplied by 0).
    qb = jnp.broadcast_to(q4, (B, heads, N, inner)).reshape(B * heads, N, inner)
    kb = (k4 * mask).reshape(B * heads, N, inner)
    sim = jnp.einsum('zid,zjd->zij', qb, kb,
                     preferred_element_type=jnp.float32)                   # (B*heads, N, N)

    # --- softmax (exact division, matching torch.softmax)
    sim = sim - jnp.max(sim, axis=-1, keepdims=True)
    p = jnp.exp(sim)
    attn = p / jnp.sum(p, axis=-1, keepdims=True)

    # --- attn @ V for all heads at once; head-masked V puts each head's context
    #     directly in its own 16-wide column block of the inner dim.
    vb = (v4 * mask).reshape(B * heads, N, inner)
    ctx = jnp.einsum('zij,zjd->zid', attn, vb,
                     preferred_element_type=jnp.float32)                   # (B*heads, N, inner)

    # Combine heads entirely in vregs: summing over the head axis yields the
    # 'b n (h d)' layout directly (no VMEM scratch, no masked partial stores).
    ctx = ctx.reshape(B, heads, N, inner).sum(axis=1).reshape(B * N, inner)  # (B*N, inner)

    # --- single lane-dense output projection (+ bias)
    y = jnp.dot(ctx, wout_ref[...], preferred_element_type=jnp.float32) + bout_ref[...]
    o_ref[...] = y.astype(o_ref.dtype)


# ----------------------------------------------------------------------------- wrapper
def attention_forward(x, kernel_params, heads, dim_head):
    B, N, D = x.shape
    x2d = x.reshape(B * N, D)                                               # free reshape

    kernel = functools.partial(_attention_kernel, B=B, N=N, heads=heads, dh=dim_head)

    y2d = pl.pallas_call(
        kernel,
        out_shape=jax.ShapeDtypeStruct((B * N, D), x.dtype),
        # Whole-array VMEM refs, no grid: avoids double-buffering & pipeline
        # prologue on this overhead/latency-bound problem size.
        in_specs=[
            pl.BlockSpec(memory_space=pltpu.MemorySpace.VMEM),              # x (flattened)
            pl.BlockSpec(memory_space=pltpu.MemorySpace.VMEM),              # Wqkv (scale folded)
            pl.BlockSpec(memory_space=pltpu.MemorySpace.VMEM),              # Wout
            pl.BlockSpec(memory_space=pltpu.MemorySpace.VMEM),              # bout
        ],
        out_specs=pl.BlockSpec(memory_space=pltpu.MemorySpace.VMEM),
    )(x2d, kernel_params["wqkv"], kernel_params["wout"], kernel_params["bout"])

    return y2d.reshape(B, N, D)


# ----------------------------------------------------------------------------- params
def init_attention_params(key, dim, heads, dim_head):
    """PyTorch nn.Linear default init: U(-1/sqrt(fan_in), 1/sqrt(fan_in))."""
    inner = heads * dim_head
    k1, k2, k3 = jax.random.split(key, 3)
    bq = 1.0 / math.sqrt(dim)
    wqkv = jax.random.uniform(k1, (dim, 3 * inner), jnp.float32, -bq, bq)   # = W_qkv.T
    bo = 1.0 / math.sqrt(inner)
    wout = jax.random.uniform(k2, (inner, dim), jnp.float32, -bo, bo)       # = W_out.T
    bout = jax.random.uniform(k3, (1, dim), jnp.float32, -bo, bo)
    return dict(wqkv=wqkv, wout=wout, bout=bout)


def prepare_attention_params(params, heads, dim_head):
    """One-time weight transform: fold the softmax scale (dim_head**-0.5 = 0.25,
    exactly representable) into the Q columns of the fused QKV weight."""
    inner = heads * dim_head
    scale = dim_head ** (-0.5)
    wqkv = params["wqkv"].at[:, :inner].multiply(scale)
    return dict(wqkv=wqkv, wout=params["wout"], bout=params["bout"])


# ----------------------------------------------------------------------------- reference
def attention_reference(x, params, heads, dim_head):
    """Pure-JAX mirror of the PyTorch Attention.forward (dropout p=0)."""
    B, N, D = x.shape
    inner = heads * dim_head
    qkv = x @ params["wqkv"]                                                # (B, N, 3*inner)
    q, k, v = jnp.split(qkv, 3, axis=-1)

    def split_heads(t):
        return t.reshape(B, N, heads, dim_head).transpose(0, 2, 1, 3)       # b h n d

    q, k, v = map(split_heads, (q, k, v))
    sim = jnp.einsum('bhid,bhjd->bhij', q, k) * dim_head ** (-0.5)
    attn = jax.nn.softmax(sim, axis=-1)
    out = jnp.einsum('bhij,bhjd->bhid', attn, v)
    out = out.transpose(0, 2, 1, 3).reshape(B, N, inner)                     # b n (h d)
    return out @ params["wout"] + params["bout"]


# ----------------------------------------------------------------------------- main
if __name__ == "__main__":
    B, N, D = 2, 8, 32           # batch, tokens, model dim
    HEADS, DIM_HEAD = 8, 16      # PyTorch Attention defaults -> inner_dim = 128

    key = jax.random.PRNGKey(0)
    kparam, kx = jax.random.split(key)

    params = init_attention_params(kparam, D, HEADS, DIM_HEAD)
    x = jax.random.normal(kx, (B, N, D), jnp.float32)

    kernel_params = prepare_attention_params(params, HEADS, DIM_HEAD)       # one-time
    out = attention_forward(x, kernel_params, HEADS, DIM_HEAD)
    out = jax.block_until_ready(out)

    ref = attention_reference(x, params, HEADS, DIM_HEAD)

    assert out.shape == (B, N, D), out.shape
    assert out.dtype == jnp.float32
    assert bool(jnp.all(jnp.isfinite(out)))
    max_err = float(jnp.max(jnp.abs(out - ref)))
    assert max_err < 5e-3, f"max abs err vs reference: {max_err}"
    print("KERNEL_OK")
</pallas_src>

<mosaic_0001>
module attributes {stable_mosaic.version = 11 : i64} {
  func.func @_attention_kernel(%arg0: memref<16x32xf32, #tpu.memory_space<vmem>>, %arg1: memref<32x384xf32, #tpu.memory_space<vmem>>, %arg2: memref<128x32xf32, #tpu.memory_space<vmem>>, %arg3: memref<1x32xf32, #tpu.memory_space<vmem>>, %arg4: memref<16x32xf32, #tpu.memory_space<vmem>>) attributes {dimension_semantics = [], scalar_prefetch = 0 : i64, scratch_operands = 0 : i64, tpu.core_type = #tpu.core_type<tc>} {
    %c0 = arith.constant 0 : index
    %c0_0 = arith.constant 0 : index
    %0 = vector.load %arg0[%c0, %c0_0] : memref<16x32xf32, #tpu.memory_space<vmem>>, vector<16x32xf32>
    %c0_1 = arith.constant 0 : index
    %c0_2 = arith.constant 0 : index
    %1 = vector.load %arg1[%c0_1, %c0_2] : memref<32x384xf32, #tpu.memory_space<vmem>>, vector<32x384xf32>
    %cst = arith.constant dense<0.000000e+00> : vector<16x384xf32>
    %2 = tpu.matmul %0, %1, %cst {dimension_numbers = #tpu.dot_dimension_numbers<[1], [0], [0], [1], [0, 0, 1, 1], [], []>} : vector<16x32xf32>, vector<32x384xf32>, vector<16x384xf32> -> vector<16x384xf32>
    %3 = vector.extract_strided_slice %2 {offsets = [0, 0], sizes = [16, 128], strides = [1, 1]} : vector<16x384xf32> to vector<16x128xf32>
    %4 = vector.shape_cast %3 : vector<16x128xf32> to vector<2x1x8x128xf32>
    %5 = vector.extract_strided_slice %2 {offsets = [0, 128], sizes = [16, 128], strides = [1, 1]} : vector<16x384xf32> to vector<16x128xf32>
    %6 = vector.shape_cast %5 : vector<16x128xf32> to vector<2x1x8x128xf32>
    %7 = vector.extract_strided_slice %2 {offsets = [0, 256], sizes = [16, 128], strides = [1, 1]} : vector<16x384xf32> to vector<16x128xf32>
    %8 = vector.shape_cast %7 : vector<16x128xf32> to vector<2x1x8x128xf32>
    %9 = tpu.iota {dimensions = array<i32: 3>} : vector<1x8x1x128xi32>
    %10 = tpu.iota {dimensions = array<i32: 1>} : vector<1x8x1x128xi32>
    %c16_i32 = arith.constant 16 : i32
    %11 = vector.broadcast %c16_i32 : i32 to vector<1x8x1x128xi32>
    %12 = arith.muli %10, %11 : vector<1x8x1x128xi32>
    %13 = arith.cmpi sge, %9, %12 : vector<1x8x1x128xi32>
    %c1_i32 = arith.constant 1 : i32
    %14 = vector.broadcast %c1_i32 : i32 to vector<1x8x1x128xi32>
    %15 = arith.addi %10, %14 : vector<1x8x1x128xi32>
    %c16_i32_3 = arith.constant 16 : i32
    %16 = vector.broadcast %c16_i32_3 : i32 to vector<1x8x1x128xi32>
    %17 = arith.muli %15, %16 : vector<1x8x1x128xi32>
    %18 = arith.cmpi slt, %9, %17 : vector<1x8x1x128xi32>
    %19 = arith.andi %13, %18 : vector<1x8x1x128xi1>
    %20 = arith.extui %19 : vector<1x8x1x128xi1> to vector<1x8x1x128xi32>
    %21 = arith.sitofp %20 : vector<1x8x1x128xi32> to vector<1x8x1x128xf32>
    %22 = vector.shape_cast %4 : vector<2x1x8x128xf32> to vector<2x1x8x128xf32>
    %23 = vector.broadcast %22 : vector<2x1x8x128xf32> to vector<2x8x8x128xf32>
    %24 = vector.shape_cast %23 : vector<2x8x8x128xf32> to vector<16x8x128xf32>
    %25 = vector.broadcast %6 : vector<2x1x8x128xf32> to vector<2x8x8x128xf32>
    %26 = vector.broadcast %21 : vector<1x8x1x128xf32> to vector<2x8x8x128xf32>
    %27 = arith.mulf %25, %26 : vector<2x8x8x128xf32>
    %28 = vector.shape_cast %27 : vector<2x8x8x128xf32> to vector<16x8x128xf32>
    "tpu.trace_start"() <{level = 10 : i32, message = "zid,zjd->zij"}> : () -> ()
    %cst_4 = arith.constant dense<0.000000e+00> : vector<16x8x8xf32>
    %29 = tpu.matmul %24, %28, %cst_4 {dimension_numbers = #tpu.dot_dimension_numbers<[2], [2], [1], [1], [0, 0, 0, 1, 1, 1], [0], [0]>} : vector<16x8x128xf32>, vector<16x8x128xf32>, vector<16x8x8xf32> -> vector<16x8x8xf32>
    "tpu.trace_stop"() : () -> ()
    %cst_5 = arith.constant dense<0xFF800000> : vector<16x8xf32>
    %30 = vector.multi_reduction <maximumf>, %29, %cst_5 [2] : vector<16x8x8xf32> to vector<16x8xf32>
    %31 = vector.shape_cast %30 : vector<16x8xf32> to vector<16x8x1xf32>
    %32 = vector.broadcast %31 : vector<16x8x1xf32> to vector<16x8x8xf32>
    %33 = arith.subf %29, %32 : vector<16x8x8xf32>
    %34 = math.exp %33 : vector<16x8x8xf32>
    %cst_6 = arith.constant dense<0.000000e+00> : vector<16x8xf32>
    %35 = vector.multi_reduction <add>, %34, %cst_6 [2] : vector<16x8x8xf32> to vector<16x8xf32>
    %36 = vector.shape_cast %35 : vector<16x8xf32> to vector<16x8x1xf32>
    %37 = vector.broadcast %36 : vector<16x8x1xf32> to vector<16x8x8xf32>
    %38 = arith.divf %34, %37 : vector<16x8x8xf32>
    %39 = vector.broadcast %8 : vector<2x1x8x128xf32> to vector<2x8x8x128xf32>
    %40 = vector.broadcast %21 : vector<1x8x1x128xf32> to vector<2x8x8x128xf32>
    %41 = arith.mulf %39, %40 : vector<2x8x8x128xf32>
    %42 = vector.shape_cast %41 : vector<2x8x8x128xf32> to vector<16x8x128xf32>
    "tpu.trace_start"() <{level = 10 : i32, message = "zij,zjd->zid"}> : () -> ()
    %cst_7 = arith.constant dense<0.000000e+00> : vector<16x8x128xf32>
    %43 = tpu.matmul %38, %42, %cst_7 {dimension_numbers = #tpu.dot_dimension_numbers<[2], [1], [1], [2], [0, 0, 0, 1, 1, 2], [0], [0]>} : vector<16x8x8xf32>, vector<16x8x128xf32>, vector<16x8x128xf32> -> vector<16x8x128xf32>
    "tpu.trace_stop"() : () -> ()
    %44 = vector.shape_cast %43 : vector<16x8x128xf32> to vector<2x8x8x128xf32>
    %cst_8 = arith.constant dense<0.000000e+00> : vector<2x8x128xf32>
    %45 = vector.multi_reduction <add>, %44, %cst_8 [1] : vector<2x8x8x128xf32> to vector<2x8x128xf32>
    %46 = vector.shape_cast %45 : vector<2x8x128xf32> to vector<16x128xf32>
    %c0_9 = arith.constant 0 : index
    %c0_10 = arith.constant 0 : index
    %47 = vector.load %arg2[%c0_9, %c0_10] : memref<128x32xf32, #tpu.memory_space<vmem>>, vector<128x32xf32>
    %cst_11 = arith.constant dense<0.000000e+00> : vector<16x32xf32>
    %48 = tpu.matmul %46, %47, %cst_11 {dimension_numbers = #tpu.dot_dimension_numbers<[1], [0], [0], [1], [0, 0, 1, 1], [], []>} : vector<16x128xf32>, vector<128x32xf32>, vector<16x32xf32> -> vector<16x32xf32>
    %c0_12 = arith.constant 0 : index
    %c0_13 = arith.constant 0 : index
    %49 = vector.load %arg3[%c0_12, %c0_13] : memref<1x32xf32, #tpu.memory_space<vmem>>, vector<1x32xf32>
    %50 = vector.broadcast %49 : vector<1x32xf32> to vector<16x32xf32>
    %51 = arith.addf %48, %50 : vector<16x32xf32>
    %c0_14 = arith.constant 0 : index
    %c0_15 = arith.constant 0 : index
    %52 = vector.load %arg4[%c0_14, %c0_15] : memref<16x32xf32, #tpu.memory_space<vmem>>, vector<16x32xf32>
    tpu.vector_store %arg4[%c0_14, %c0_15], %51 {strides = array<i32>} : memref<16x32xf32, #tpu.memory_space<vmem>>, vector<16x32xf32>,
    return
  }
}

</mosaic_0001>

<bundles_post_ra>
// kernel: tpu_custom_call.1
= control target key start
LH: loop header
LB: loop body
LE: loop exit
PB: predicated region body
PF: predicated region fallthrough
CT: control target
= control target key end

     0   :  { %v3274_v4 = vmov 0.0   ;;  %s3812_s0 = inlined_call_operand.vmem [shape: f32[16,32], index: 0, kind: input, shape index: {}]   ;;  %s3813_s1 = inlined_call_operand.vmem [shape: f32[32,384], index: 1, kind: input, shape index: {}]   ;;  %s3814_s2 = inlined_call_operand.vmem [shape: f32[128,32], index: 2, kind: input, shape index: {}]   ;;  %s3815_s3 = inlined_call_operand.vmem [shape: f32[1,32], index: 3, kind: input, shape index: {}]   ;;  %s3816_s4 = inlined_call_operand.hbm [shape: f32[16,32], index: 4, kind: output, shape index: {}]  }
   0x1   :  { %v30_v0 = vld [vmem:[%s3813_s1 + $0x50] sm:$0xff]  ;;  %v29_v1 = vld [vmem:[%s3813_s1 + $0x48] sm:$0xff]  ;;  %v27_v2 = vld [vmem:[%s3813_s1 + $0x38] sm:$0xff]  ;;  %103 = vmatprep.mubr.f32.mxu0 %v3274_v4  ;;  %3008 = vmatprep.subr.mxu1 %v3274_v4 }
   0x2   :  { %63 = vmatprep.subr.mxu0 %v30_v0  ;;  %v26_v3 = vld [vmem:[%s3813_s1 + $0x30] sm:$0xff]  ;;  %v24_v5 = vld [vmem:[%s3813_s1 + $0x20] sm:$0xff]  ;;  %v23_v6 = vld [vmem:[%s3813_s1 + $0x18] sm:$0xff] }
   0x3   :  { %64 = vmatpush1.msra.mxu0 %v29_v1  ;;  %v21_v7 = vld [vmem:[%s3813_s1 + $0x8] sm:$0xff] }
   0x4   :  { %65 = vmatprep.subr.mxu0 %v27_v2 }
   0x5   :  { %66 = vmatpush1.msra.mxu0 %v26_v3 }
   0x6   :  { %9 = vsyncpa [#allocation3], 0  ;;  %67 = vmatprep.subr.mxu0 %v24_v5  ;;  %v20_v8 = vld [vmem:[%s3813_s1] sm:$0xff]  ;;  %vm32_vm0 = vcmask 261120   ;;  %v31_v10 = vld [vmem:[%s3813_s1 + $0x58] sm:$0xff]  ;;  %vm3275_vm1 = vmmov 0   ;;  %v191_v15 = vlaneseq }
   0x7   :  { %68 = vmatpush1.msra.mxu0 %v23_v6  ;;  %v18_v9 = vld [vmem:[%s3812_s0] sm:$0xff]  ;;  %v19_v12 = vld [vmem:[%s3812_s0 + $0x8] sm:$0xff]  ;;  %v22_v14 = vld [vmem:[%s3813_s1 + $0x10] sm:$0xff]  ;;  %3010 = vmatprep.mubr.msk.f32.mxu1 %vm3275_vm1, %v3274_v4  ;;  %s3276_s20 = smov [#allocation2]  }
   0x8   :  { %69 = vmatprep.subr.mxu0 %v21_v7  ;;  %v28_v11 = vld [vmem:[%s3813_s1 + $0x40] sm:$0xff]  ;;  %v25_v13 = vld [vmem:[%s3813_s1 + $0x28] sm:$0xff]  ;;  %v3358_v16 = vand.u32 127, %v191_v15  ;;  %s2849_s21 = sshll.u32 %s3276_s20, 4  ;;  %s2850_s21 = int_to_ptr.vmem [resolvable:$true] %s2849_s21 }
   0x9   :  { %70 = vmatpush1.msra.mxu0 %v20_v8  ;;  %s3252_s22 = scalar_lea.vmem %s2850_s21, 256  ;;  %p3257_p1 = scmp.lt.s32.totalorder %s2850_s21, %s2850_s21 }
   0xa   :  { %2860 = vmatmul.mubr.msk.f32.vlgmr.msra.gmra.mxu0 %vm32_vm0, %v18_v9  ;;  %2977 = vmatprep.subr.mxu0 %v31_v10  ;;  %vm197_vm2 = vcmp.ge.s32.totalorder %v3358_v16, 64  ;;  %vm205_vm3 = vcmp.lt.s32.totalorder %v3358_v16, 80  ;;  %vm201_vm4 = vcmp.lt.s32.totalorder %v3358_v16, 16  ;;  %vm194_vm6 = vcmp.ge.s32.totalorder %v3358_v16, 16  ;;  %p3253_p0 = scmp.ne.s32.totalorder %s2850_s21, %s3252_s22  ;;  %p3258_p2 = scmp.lt.s32.totalorder %s3252_s22, %s3252_s22 }
   0xb   :  { %109 = vmatprep.mubr.f32.mxu0 %v3274_v4  ;;  %2978 = vmatpush3.msra.mxu0 %v31_v10  ;;  %vm213_vm5 = vmand %vm197_vm2, %vm205_vm3  ;;  %vm202_vm7 = vcmp.lt.s32.totalorder %v3358_v16, 32  ;;  %vm199_vm8 = vcmp.ge.s32.totalorder %v3358_v16, 96  ;;  %vm207_vm9 = vcmp.lt.s32.totalorder %v3358_v16, 112  ;;  %v3370_v18 = vsel %vm201_vm4, 1.0, %v3274_v4 }
   0xc   :  { %2979 = vmatprep.subr.mxu0 %v28_v11  ;;  %v3373_v19 = vsel %vm213_vm5, 1.0, %v3274_v4  ;;  %vm210_vm10 = vmand %vm194_vm6, %vm202_vm7  ;;  %vm195_vm12 = vcmp.ge.s32.totalorder %v3358_v16, 32  ;;  %vm203_vm13 = vcmp.lt.s32.totalorder %v3358_v16, 48  ;;  %vm196_vm15 = vcmp.ge.s32.totalorder %v3358_v16, 48  ;;  %p3259_p3 = por %p3258_p2, %p3257_p1 }
   0xd   :  { %2980 = vmatpush3.msra.mxu0 %v28_v11  ;;  %vm215_vm11 = vmand %vm199_vm8, %vm207_vm9  ;;  %v3386_v24 = vsel %vm210_vm10, 1.0, %v3274_v4  ;;  %vm204_vm2 = vcmp.lt.s32.totalorder %v3358_v16, 64  ;;  %vm198_vm4 = vcmp.ge.s32.totalorder %v3358_v16, 80  ;;  %vm206_vm5 = vcmp.lt.s32.totalorder %v3358_v16, 96 }
   0xe   :  { %2861 = vmatmul.mubr.msk.f32.gmra.mxu0 %vm32_vm0, %v19_v12  ;;  %2981 = vmatprep.subr.mxu0 %v25_v13  ;;  %v3389_v25 = vsel %vm215_vm11, 1.0, %v3274_v4  ;;  %vm211_vm14 = vmand %vm195_vm12, %vm203_vm13  ;;  %vm200_vm7 = vcmp.ge.s32.totalorder %v3358_v16, 112  ;;  %vm1369_vm8 = vcmask 64512   ;;  %p3260_p4 = pnand %p3259_p3, %p3253_p0 }
   0xf   :  { %2982 = vmatpush3.msra.mxu0 %v25_v13  ;;  %2985 = vmatprep.mubr.msk.f32.mxu0 %vm32_vm0, %v18_v9  ;;  %v3404_v29 = vsel %vm211_vm14, 1.0, %v3274_v4  ;;  %vm212_vm3 = vmand %vm196_vm15, %vm204_vm2  ;;  %v3452_v38 = vsel %vm200_vm7, 1.0, %v3274_v4 }
  0x10   :  { %2983 = vmatprep.subr.mxu0 %v22_v14  ;;  %v3421_v32 = vsel %vm212_vm3, 1.0, %v3274_v4  ;;  %vm214_vm6 = vmand %vm198_vm4, %vm206_vm5 }
  0x11   :  { %2984 = vmatpush3.msra.mxu0 %v22_v14  ;;  %v3436_v35 = vsel %vm214_vm6, 1.0, %v3274_v4 }
  0x12   :  { %2986 = vmatmul.mubr.msk.f32.vlgmr.msra.gmra.mxu0 %vm32_vm0, %v19_v12  ;;  %2988 = vmatprep.subr.mxu0 %v3274_v4 }
  0x13   :  { %2990 = vmatprep.mubr.msk.f32.mxu0 %vm3275_vm1, %v3274_v4 }
  0xca   :  { %v3367_v17 = vpop.f32.mrf.mxu0 }
  0xcc   :  { %v3375_v20 = vpop.f32.mrf.mxu0 }
  0xcd   :  { %v233_v21 = vmul.f32 %v3370_v18, %v3375_v20  ;;  %v237_v22 = vmul.f32 %v3373_v19, %v3375_v20  ;;  %v234_v27 = vmul.f32 %v3386_v24, %v3375_v20  ;;  %v239_v28 = vmul.f32 %v3389_v25, %v3375_v20 }
  0xce   :  { %v3383_v23 = vpop.f32.mrf.mxu0  ;;  %v235_v31 = vmul.f32 %v3404_v29, %v3375_v20  ;;  %v236_v34 = vmul.f32 %v3421_v32, %v3375_v20  ;;  %v238_v37 = vmul.f32 %v3436_v35, %v3375_v20  ;;  %v240_v40 = vmul.f32 %v3452_v38, %v3375_v20 }
  0xcf   :  { %2989 = vmatpush3.xpose.msra.mxu0 %v233_v21  ;;  %3009 = vmatpush3.xpose.msra.mxu1 %v237_v22 }
  0xd0   :  { %2993 = vmatprep.subr.mxu0 %v3274_v4  ;;  %3018 = vmatprep.subr.mxu1 %v3274_v4  ;;  %v3393_v26 = vpop.f32.mrf.mxu0 }
  0xd1   :  { %v241_v30 = vmul.f32 %v3370_v18, %v3393_v26  ;;  %v243_v33 = vmul.f32 %v3404_v29, %v3393_v26  ;;  %v245_v36 = vmul.f32 %v3373_v19, %v3393_v26  ;;  %v247_v39 = vmul.f32 %v3389_v25, %v3393_v26 }
  0xd2   :  { %2991 = vmatmul.mubr.f32.vlgmr.msra.gmra.mxu0 %v3367_v17  ;;  %3011 = vmatmul.mubr.f32.vlgmr.msra.gmra.mxu1 %v3367_v17  ;;  %v242_v41 = vmul.f32 %v3386_v24, %v3393_v26  ;;  %v244_v42 = vmul.f32 %v3421_v32, %v3393_v26  ;;  %v246_v43 = vmul.f32 %v3436_v35, %v3393_v26  ;;  %v3502_v45 = vpop.f32.mrf.mxu0 }
  0xd3   :  { %2994 = vmatpush3.xpose.msra.mxu0 %v234_v27  ;;  %3019 = vmatpush3.xpose.msra.mxu1 %v239_v28  ;;  %v248_v44 = vmul.f32 %v3452_v38, %v3393_v26 }
  0xd4   :  { %2995 = vmatprep.mubr.msk.f32.mxu0 %vm3275_vm1, %v3274_v4  ;;  %3020 = vmatprep.mubr.msk.f32.mxu1 %vm3275_vm1, %v3274_v4  ;;  %v3504_v46 = vpop.f32.mrf.mxu0 }
  0xd5   :  { %2998 = vmatprep.subr.mxu0 %v3274_v4  ;;  %3028 = vmatprep.subr.mxu1 %v3274_v4  ;;  %v1546_v47 = vmul.f32 %v3370_v18, %v3504_v46  ;;  %v1547_v48 = vmul.f32 %v3386_v24, %v3504_v46 }
  0xd6   :  { %2996 = vmatmul.mubr.f32.vlgmr.msra.gmra.mxu0 %v3367_v17  ;;  %3021 = vmatmul.mubr.f32.vlgmr.msra.gmra.mxu1 %v3367_v17 }
  0xd7   :  { %2999 = vmatpush3.xpose.msra.mxu0 %v235_v31  ;;  %3029 = vmatpush3.xpose.msra.mxu1 %v241_v30 }
  0xd8   :  { %3000 = vmatprep.mubr.msk.f32.mxu0 %vm3275_vm1, %v3274_v4  ;;  %3030 = vmatprep.mubr.msk.f32.mxu1 %vm3275_vm1, %v3274_v4 }
  0xd9   :  { %3003 = vmatprep.subr.mxu0 %v3274_v4  ;;  %3038 = vmatprep.subr.mxu1 %v3274_v4 }
  0xda   :  { %3001 = vmatmul.mubr.f32.vlgmr.msra.gmra.mxu0 %v3367_v17  ;;  %3031 = vmatmul.mubr.f32.vlgmr.msra.gmra.mxu1 %v3383_v23 }
  0xdb   :  { %3004 = vmatpush3.xpose.msra.mxu0 %v236_v34  ;;  %3039 = vmatpush3.xpose.msra.mxu1 %v243_v33 }
  0xdc   :  { %3005 = vmatprep.mubr.msk.f32.mxu0 %vm3275_vm1, %v3274_v4  ;;  %3040 = vmatprep.mubr.msk.f32.mxu1 %vm3275_vm1, %v3274_v4 }
  0xdd   :  { %3013 = vmatprep.subr.mxu0 %v3274_v4  ;;  %3048 = vmatprep.subr.mxu1 %v3274_v4 }
  0xde   :  { %3006 = vmatmul.mubr.f32.vlgmr.msra.gmra.mxu0 %v3367_v17  ;;  %3041 = vmatmul.mubr.f32.vlgmr.msra.gmra.mxu1 %v3383_v23 }
  0xdf   :  { %3014 = vmatpush3.xpose.msra.mxu0 %v238_v37  ;;  %3049 = vmatpush3.xpose.msra.mxu1 %v245_v36 }
  0xe0   :  { %3015 = vmatprep.mubr.msk.f32.mxu0 %vm3275_vm1, %v3274_v4  ;;  %3050 = vmatprep.mubr.msk.f32.mxu1 %vm3275_vm1, %v3274_v4 }
  0xe1   :  { %3023 = vmatprep.subr.mxu0 %v3274_v4  ;;  %3058 = vmatprep.subr.mxu1 %v3274_v4 }
  0xe2   :  { %3016 = vmatmul.mubr.f32.vlgmr.msra.gmra.mxu0 %v3367_v17  ;;  %3051 = vmatmul.mubr.f32.vlgmr.msra.gmra.mxu1 %v3383_v23 }
  0xe3   :  { %3024 = vmatpush3.xpose.msra.mxu0 %v240_v40  ;;  %3059 = vmatpush3.xpose.msra.mxu1 %v247_v39 }
  0xe4   :  { %3025 = vmatprep.mubr.msk.f32.mxu0 %vm3275_vm1, %v3274_v4  ;;  %3060 = vmatprep.mubr.msk.f32.mxu1 %vm3275_vm1, %v3274_v4 }
  0xe5   :  { %3033 = vmatprep.subr.mxu0 %v3274_v4  ;;  %3068 = vmatprep.subr.mxu1 %v3274_v4 }
  0xe6   :  { %3026 = vmatmul.mubr.f32.vlgmr.msra.gmra.mxu0 %v3367_v17  ;;  %3061 = vmatmul.mubr.f32.vlgmr.msra.gmra.mxu1 %v3383_v23 }
  0xe7   :  { %3034 = vmatpush3.xpose.msra.mxu0 %v242_v41  ;;  %3035 = vmatprep.mubr.msk.f32.mxu0 %vm3275_vm1, %v3274_v4 }
  0xe8   :  { %3043 = vmatprep.subr.mxu0 %v3274_v4  ;;  %3070 = vmatprep.mubr.msk.f32.mxu1 %vm3275_vm1, %v3274_v4 }
  0xe9   :  { %3069 = vmatpush3.msra.mxu1 %v1546_v47 }
  0xea   :  { %3036 = vmatmul.mubr.f32.vlgmr.msra.gmra.mxu0 %v3383_v23  ;;  %3078 = vmatprep.subr.mxu1 %v3274_v4 }
  0xeb   :  { %3044 = vmatpush3.xpose.msra.mxu0 %v244_v42  ;;  %3045 = vmatprep.mubr.msk.f32.mxu0 %vm3275_vm1, %v3274_v4 }
  0xec   :  { %3053 = vmatprep.subr.mxu0 %v3274_v4 }
  0xee   :  { %3046 = vmatmul.mubr.f32.vlgmr.msra.gmra.mxu0 %v3383_v23 }
  0xef   :  { %3054 = vmatpush3.xpose.msra.mxu0 %v246_v43  ;;  %3055 = vmatprep.mubr.msk.f32.mxu0 %vm3275_vm1, %v3274_v4 }
  0xf0   :  { %3063 = vmatprep.subr.mxu0 %v3274_v4 }
  0xf2   :  { %3056 = vmatmul.mubr.f32.vlgmr.msra.gmra.mxu0 %v3383_v23 }
  0xf3   :  { %3064 = vmatpush3.xpose.msra.mxu0 %v248_v44  ;;  %3065 = vmatprep.mubr.msk.f32.mxu0 %vm3275_vm1, %v3274_v4 }
  0xf4   :  { %3073 = vmatprep.subr.mxu0 %v3274_v4 }
  0xf6   :  { %3066 = vmatmul.mubr.f32.vlgmr.msra.gmra.mxu0 %v3383_v23 }
  0xf7   :  { %3075 = vmatprep.mubr.msk.f32.mxu0 %vm3275_vm1, %v3274_v4  ;;  %3074 = vmatpush3.msra.mxu0 %v1547_v48 }
  0xf8   :  { %3083 = vmatprep.subr.mxu0 %v3274_v4 }
 0x192   :  { %v3512_v49 = vpop.f32.mrf.mxu0  ;;  %v3514_v50 = vpop.f32.mrf.mxu1 }
 0x193   :  { %v1370_v51 = vsel %vm1369_vm8, %v3512_v49, -inf  ;;  %v1382_v61 = vsel %vm1369_vm8, %v3514_v50, -inf }
 0x194   :  { %v3012_v52 = vpop.f32.mrf.mxu1  ;;  %1371 = vmax.xlane.f32.xlu0 %v1370_v51  ;;  %v2992_v53 = vpop.f32.mrf.mxu0 }
 0x196   :  { %v3518_v54 = vpop.f32.mrf.mxu0  ;;  %v3520_v55 = vpop.f32.mrf.mxu1 }
 0x197   :  { %v1373_v56 = vsel %vm1369_vm8, %v3518_v54, -inf  ;;  %v1388_v3 = vsel %vm1369_vm8, %v3520_v55, -inf }
 0x198   :  { %v3022_v57 = vpop.f32.mrf.mxu1  ;;  %1374 = vmax.xlane.f32.xlu0 %v1373_v56  ;;  %v2997_v58 = vpop.f32.mrf.mxu0 }
 0x19a   :  { %v3524_v59 = vpop.f32.mrf.mxu0  ;;  %v3526_v60 = vpop.f32.mrf.mxu1 }
 0x19b   :  { %v1376_v62 = vsel %vm1369_vm8, %v3524_v59, -inf  ;;  %v1394_v8 = vsel %vm1369_vm8, %v3526_v60, -inf }
 0x19c   :  { %v3032_v63 = vpop.f32.mrf.mxu1  ;;  %1383 = vmax.xlane.f32.xlu0 %v1382_v61  ;;  %1377 = vmax.xlane.f32.xlu1 %v1376_v62  ;;  %v3002_v0 = vpop.f32.mrf.mxu0 }
 0x19e   :  { %v3532_v1 = vpop.f32.mrf.mxu0  ;;  %v3534_v2 = vpop.f32.mrf.mxu1 }
 0x19f   :  { %v1379_v5 = vsel %vm1369_vm8, %v3532_v1, -inf  ;;  %v1400_v16 = vsel %vm1369_vm8, %v3534_v2, -inf }
 0x1a0   :  { %v3042_v6 = vpop.f32.mrf.mxu1  ;;  %1389 = vmax.xlane.f32.xlu0 %v1388_v3  ;;  %1380 = vmax.xlane.f32.xlu1 %v1379_v5  ;;  %v3007_v7 = vpop.f32.mrf.mxu0 }
 0x1a2   :  { %v3542_v9 = vpop.f32.mrf.mxu0  ;;  %v3544_v10 = vpop.f32.mrf.mxu1 }
 0x1a3   :  { %v1385_v11 = vsel %vm1369_vm8, %v3542_v9, -inf  ;;  %v1406_v23 = vsel %vm1369_vm8, %v3544_v10, -inf }
 0x1a4   :  { %v3052_v12 = vpop.f32.mrf.mxu1  ;;  %1395 = vmax.xlane.f32.xlu0 %v1394_v8  ;;  %1386 = vmax.xlane.f32.xlu1 %v1385_v11  ;;  %v3017_v13 = vpop.f32.mrf.mxu0 }
 0x1a6   :  { %v3548_v14 = vpop.f32.mrf.mxu0  ;;  %v3550_v15 = vpop.f32.mrf.mxu1 }
 0x1a7   :  { %v1391_v17 = vsel %vm1369_vm8, %v3548_v14, -inf  ;;  %v1412_v30 = vsel %vm1369_vm8, %v3550_v15, -inf }
 0x1a8   :  { %v3062_v20 = vpop.f32.mrf.mxu1  ;;  %1401 = vmax.xlane.f32.xlu0 %v1400_v16  ;;  %1392 = vmax.xlane.f32.xlu1 %v1391_v17  ;;  %v3027_v21 = vpop.f32.mrf.mxu0 }
 0x1aa   :  { %v3556_v22 = vpop.f32.mrf.mxu0 }
 0x1ab   :  { %v1397_v26 = vsel %vm1369_vm8, %v3556_v22, -inf }
 0x1ac   :  { %1407 = vmax.xlane.f32.xlu0 %v1406_v23  ;;  %1398 = vmax.xlane.f32.xlu1 %v1397_v26  ;;  %v3037_v27 = vpop.f32.mrf.mxu0 }
 0x1ae   :  { %v3562_v28 = vpop.f32.mrf.mxu0 }
 0x1af   :  { %v1403_v31 = vsel %vm1369_vm8, %v3562_v28, -inf }
 0x1b0   :  { %1413 = vmax.xlane.f32.xlu0 %v1412_v30  ;;  %1404 = vmax.xlane.f32.xlu1 %v1403_v31  ;;  %v3047_v33 = vpop.f32.mrf.mxu0 }
 0x1b2   :  { %v3568_v34 = vpop.f32.mrf.mxu0 }
 0x1b3   :  { %v1409_v36 = vsel %vm1369_vm8, %v3568_v34, -inf }
 0x1b4   :  { %1410 = vmax.xlane.f32.xlu1 %v1409_v36  ;;  %v3057_v37 = vpop.f32.mrf.mxu0 }
 0x1b6   :  { %v3572_v39 = vpop.f32.mrf.mxu0 }
 0x1b7   :  { %v1415_v40 = vsel %vm1369_vm8, %v3572_v39, -inf }
 0x1b8   :  { %1416 = vmax.xlane.f32.xlu1 %v1415_v40  ;;  %v3067_v41 = vpop.f32.mrf.mxu0 }
 0x21d   :  { %v1372_v42 = vpop.xlane.xlu0 %1371 }
 0x21e   :  { %v1418_v43 = vsub.f32 %v3512_v49, %v1372_v42 }
 0x220   :  { %v1434_v44 = vmul.f32 1.442695, %v1418_v43 }
 0x221   :  { %v1375_v47 = vpop.xlane.xlu0 %1374 }
 0x222   :  { %3188 = vpow2.f32 %v1434_v44  ;;  %v1419_v48 = vsub.f32 %v3518_v54, %v1375_v47 }
 0x224   :  { %v1436_v51 = vmul.f32 1.442695, %v1419_v48 }
 0x225   :  { %v1384_v52 = vpop.xlane.xlu0 %1383  ;;  %v1378_v53 = vpop.xlane.xlu1 %1377 }
 0x226   :  { %3190 = vpow2.f32 %v1436_v51  ;;  %v1422_v56 = vsub.f32 %v3514_v50, %v1384_v52  ;;  %v1420_v57 = vsub.f32 %v3524_v59, %v1378_v53 }
 0x228   :  { %v1438_v58 = vmul.f32 1.442695, %v1420_v57  ;;  %v1442_v61 = vmul.f32 1.442695, %v1422_v56 }
 0x229   :  { %v1390_v62 = vpop.xlane.xlu0 %1389  ;;  %v1381_v63 = vpop.xlane.xlu1 %1380 }
 0x22a   :  { %v1424_v0 = vsub.f32 %v3520_v55, %v1390_v62  ;;  %v1421_v49 = vsub.f32 %v3532_v1, %v1381_v63  ;;  %3192 = vpow2.f32 %v1438_v58 }
 0x22b   :  { %3194 = vpow2.f32 %v1442_v61 }
 0x22c   :  { %v1440_v3 = vmul.f32 1.442695, %v1421_v49  ;;  %v1446_v54 = vmul.f32 1.442695, %v1424_v0 }
 0x22d   :  { %v1396_v5 = vpop.xlane.xlu0 %1395  ;;  %v1387_v6 = vpop.xlane.xlu1 %1386 }
 0x22e   :  { %v1426_v7 = vsub.f32 %v3526_v60, %v1396_v5  ;;  %v1423_v50 = vsub.f32 %v3542_v9, %v1387_v6  ;;  %3196 = vpow2.f32 %v1440_v3 }
 0x22f   :  { %v3584_v8 = vpop.eup %3188  ;;  %3198 = vpow2.f32 %v1446_v54 }
 0x230   :  { %v1444_v59 = vmul.f32 1.442695, %v1423_v50  ;;  %v1466_v11 = vsel %vm1369_vm8, %v3584_v8, 0.0  ;;  %v1450_v55 = vmul.f32 1.442695, %v1426_v7 }
 0x231   :  { %1467 = vadd.xlane.f32.xlu0 %v1466_v11  ;;  %v1402_v1 = vpop.xlane.xlu0 %1401  ;;  %v1393_v12 = vpop.xlane.xlu1 %1392 }
 0x232   :  { %v1428_v13 = vsub.f32 %v3534_v2, %v1402_v1  ;;  %v1425_v16 = vsub.f32 %v3548_v14, %v1393_v12  ;;  %3200 = vpow2.f32 %v1444_v59 }
 0x233   :  { %v3590_v17 = vpop.eup %3190  ;;  %3202 = vpow2.f32 %v1450_v55 }
 0x234   :  { %v1448_v60 = vmul.f32 1.442695, %v1425_v16  ;;  %v1469_v9 = vsel %vm1369_vm8, %v3590_v17, 0.0  ;;  %v1454_v20 = vmul.f32 1.442695, %v1428_v13 }
 0x235   :  { %v1408_v21 = vpop.xlane.xlu0 %1407  ;;  %v1399_v23 = vpop.xlane.xlu1 %1398  ;;  %1470 = vadd.xlane.f32.xlu1 %v1469_v9 }
 0x236   :  { %v1430_v26 = vsub.f32 %v3544_v10, %v1408_v21  ;;  %v1427_v27 = vsub.f32 %v3556_v22, %v1399_v23  ;;  %3204 = vpow2.f32 %v1448_v60 }
 0x237   :  { %v3596_v2 = vpop.eup %3192  ;;  %3206 = vpow2.f32 %v1454_v20 }
 0x238   :  { %v1452_v14 = vmul.f32 1.442695, %v1427_v27  ;;  %v1458_v30 = vmul.f32 1.442695, %v1430_v26  ;;  %v1472_v33 = vsel %vm1369_vm8, %v3596_v2, 0.0  ;;  %v3600_v37 = vpop.eup %3194  ;;  %v1548_v26 = vmul.f32 %v3404_v29, %v3504_v46 }
 0x239   :  { %v1414_v31 = vpop.xlane.xlu0 %1413  ;;  %v1405_v36 = vpop.xlane.xlu1 %1404  ;;  %1473 = vadd.xlane.f32.xlu0 %v1472_v33  ;;  %v1478_v43 = vsel %vm1369_vm8, %v3600_v37, 0.0 }
 0x23a   :  { %v1432_v40 = vsub.f32 %v3550_v15, %v1414_v31  ;;  %v1429_v10 = vsub.f32 %v3562_v28, %v1405_v36  ;;  %3208 = vpow2.f32 %v1452_v14 }
 0x23b   :  { %v3604_v22 = vpop.eup %3196  ;;  %3210 = vpow2.f32 %v1458_v30 }
 0x23c   :  { %v1456_v41 = vmul.f32 1.442695, %v1429_v10  ;;  %v1462_v42 = vmul.f32 1.442695, %v1432_v40  ;;  %v1475_v47 = vsel %vm1369_vm8, %v3604_v22, 0.0  ;;  %v3610_v48 = vpop.eup %3198 }
 0x23d   :  { %v1411_v44 = vpop.xlane.xlu1 %1410  ;;  %1479 = vadd.xlane.f32.xlu0 %v1478_v43  ;;  %1476 = vadd.xlane.f32.xlu1 %v1475_v47  ;;  %v1484_v52 = vsel %vm1369_vm8, %v3610_v48, 0.0 }
 0x23e   :  { %v1431_v15 = vsub.f32 %v3568_v34, %v1411_v44  ;;  %3212 = vpow2.f32 %v1456_v41 }
 0x23f   :  { %v3613_v28 = vpop.eup %3200  ;;  %3214 = vpow2.f32 %v1462_v42  ;;  %v1550_v42 = vmul.f32 %v3373_v19, %v3504_v46 }
 0x240   :  { %v1460_v51 = vmul.f32 1.442695, %v1431_v15  ;;  %v1481_v53 = vsel %vm1369_vm8, %v3613_v28, 0.0  ;;  %v3619_v57 = vpop.eup %3202 }
 0x241   :  { %v1417_v56 = vpop.xlane.xlu1 %1416  ;;  %1485 = vadd.xlane.f32.xlu0 %v1484_v52  ;;  %1482 = vadd.xlane.f32.xlu1 %v1481_v53  ;;  %v1490_v62 = vsel %vm1369_vm8, %v3619_v57, 0.0  ;;  %v1552_v52 = vmul.f32 %v3389_v25, %v3504_v46  ;;  %v1551_v53 = vmul.f32 %v3436_v35, %v3504_v46 }
 0x242   :  { %3216 = vpow2.f32 %v1460_v51  ;;  %v1433_v34 = vsub.f32 %v3572_v39, %v1417_v56 }
 0x243   :  { %v3622_v58 = vpop.eup %3204 }
 0x244   :  { %v1464_v61 = vmul.f32 1.442695, %v1433_v34  ;;  %v1487_v63 = vsel %vm1369_vm8, %v3622_v58, 0.0  ;;  %v3628_v0 = vpop.eup %3206 }
 0x245   :  { %1491 = vadd.xlane.f32.xlu0 %v1490_v62  ;;  %1488 = vadd.xlane.f32.xlu1 %v1487_v63  ;;  %v1496_v3 = vsel %vm1369_vm8, %v3628_v0, 0.0  ;;  %v1554_v63 = vmul.f32 %v3502_v45, %v3370_v18 }
 0x246   :  { %3218 = vpow2.f32 %v1464_v61 }
 0x247   :  { %v3630_v49 = vpop.eup %3208 }
 0x248   :  { %v1493_v39 = vsel %vm1369_vm8, %v3630_v49, 0.0  ;;  %v3636_v54 = vpop.eup %3210 }
 0x249   :  { %1497 = vadd.xlane.f32.xlu0 %v1496_v3  ;;  %1494 = vadd.xlane.f32.xlu1 %v1493_v39  ;;  %v1502_v6 = vsel %vm1369_vm8, %v3636_v54, 0.0 }
 0x24b   :  { %v3638_v5 = vpop.eup %3212 }
 0x24c   :  { %v1499_v7 = vsel %vm1369_vm8, %v3638_v5, 0.0  ;;  %v3644_v50 = vpop.eup %3214 }
 0x24d   :  { %1503 = vadd.xlane.f32.xlu0 %v1502_v6  ;;  %1500 = vadd.xlane.f32.xlu1 %v1499_v7  ;;  %v1508_v55 = vsel %vm1369_vm8, %v3644_v50, 0.0  ;;  %v1556_v6 = vmul.f32 %v3502_v45, %v3404_v29  ;;  %v1555_v7 = vmul.f32 %v3502_v45, %v3386_v24  ;;  %v1558_v24 = vmul.f32 %v3502_v45, %v3373_v19 }
 0x24f   :  { %v3646_v59 = vpop.eup %3216 }
 0x250   :  { %v1505_v11 = vsel %vm1369_vm8, %v3646_v59, 0.0 }
 0x251   :  { %1509 = vadd.xlane.f32.xlu0 %v1508_v55  ;;  %1506 = vadd.xlane.f32.xlu1 %v1505_v11  ;;  %v1557_v55 = vmul.f32 %v3502_v45, %v3421_v32 }
 0x253   :  { %v3652_v1 = vpop.eup %3218 }
 0x254   :  { %v1511_v12 = vsel %vm1369_vm8, %v3652_v1, 0.0 }
 0x255   :  { %1512 = vadd.xlane.f32.xlu1 %v1511_v12 }
 0x2ba   :  { %v1468_v13 = vpop.xlane.xlu0 %1467 }
 0x2bb   :  { %3220 = vrcp.f32 %v1468_v13  ;;  %v1559_v13 = vmul.f32 %v3502_v45, %v3436_v35  ;;  %v1561_v35 = vmul.f32 %v3502_v45, %v3452_v38 }
 0x2be   :  { %v1471_v16 = vpop.xlane.xlu1 %1470 }
 0x2bf   :  { %3222 = vrcp.f32 %v1471_v16 }
 0x2c2   :  { %v1474_v60 = vpop.xlane.xlu0 %1473 }
 0x2c3   :  { %3224 = vrcp.f32 %v1474_v60 }
 0x2c6   :  { %v1480_v9 = vpop.xlane.xlu0 %1479  ;;  %v1477_v20 = vpop.xlane.xlu1 %1476 }
 0x2c7   :  { %3226 = vrcp.f32 %v1480_v9  ;;  %v2754_v9 = vld [vmem:[%s3814_s2 + $0x50] sm:$0xff] }
 0x2c8   :  { %v3221_v21 = vpop.eup %3220  ;;  %3228 = vrcp.f32 %v1477_v20  ;;  %v2753_v20 = vld [vmem:[%s3814_s2 + $0x48] sm:$0xff] }
 0x2c9   :  { %v1515_v23 = vmul.f32 %v3221_v21, %v3584_v8  ;;  %v1549_v8 = vmul.f32 %v3421_v32, %v3504_v46  ;;  %v1560_v32 = vmul.f32 %v3502_v45, %v3389_v25  ;;  %v2757_v45 = vld [vmem:[%s3814_s2 + $0x68] sm:$0xff]  ;;  %v2752_v21 = vld [vmem:[%s3814_s2 + $0x40] sm:$0xff] }
 0x2ca   :  { %v1486_v27 = vpop.xlane.xlu0 %1485  ;;  %v1483_v14 = vpop.xlane.xlu1 %1482 }
 0x2cb   :  { %3071 = vmatmul.mubr.msk.f32.vlgmr.msra.gmra.mxu1 %vm1369_vm8, %v1515_v23  ;;  %3230 = vrcp.f32 %v1486_v27  ;;  %v2751_v23 = vld [vmem:[%s3814_s2 + $0x38] sm:$0xff]  ;;  %v2749_v27 = vld [vmem:[%s3814_s2 + $0x28] sm:$0xff] }
 0x2cc   :  { %v3223_v30 = vpop.eup %3222  ;;  %3079 = vmatpush3.msra.mxu1 %v1548_v26  ;;  %3080 = vmatprep.mubr.msk.f32.mxu1 %vm3275_vm1, %v3274_v4  ;;  %3232 = vrcp.f32 %v1483_v14  ;;  %v2750_v26 = vld [vmem:[%s3814_s2 + $0x30] sm:$0xff]  ;;  %v2748_v14 = vld [vmem:[%s3814_s2 + $0x20] sm:$0xff] }
 0x2cd   :  { %v1517_v31 = vmul.f32 %v3223_v30, %v3590_v17  ;;  %3088 = vmatprep.subr.mxu1 %v3274_v4  ;;  %v2747_v30 = vld [vmem:[%s3814_s2 + $0x18] sm:$0xff] }
 0x2ce   :  { %v1492_v33 = vpop.xlane.xlu0 %1491  ;;  %v1489_v36 = vpop.xlane.xlu1 %1488 }
 0x2cf   :  { %3076 = vmatmul.mubr.msk.f32.vlgmr.msra.gmra.mxu0 %vm1369_vm8, %v1517_v31  ;;  %3234 = vrcp.f32 %v1492_v33  ;;  %v2746_v31 = vld [vmem:[%s3814_s2 + $0x10] sm:$0xff]  ;;  %v2744_v33 = vld [vmem:[%s3814_s2] sm:$0xff] }
 0x2d0   :  { %3084 = vmatpush3.msra.mxu0 %v1549_v8  ;;  %3085 = vmatprep.mubr.msk.f32.mxu0 %vm3275_vm1, %v3274_v4  ;;  %v3225_v40 = vpop.eup %3224  ;;  %3236 = vrcp.f32 %v1489_v36  ;;  %v2745_v8 = vld [vmem:[%s3814_s2 + $0x8] sm:$0xff] }
 0x2d1   :  { %3093 = vmatprep.subr.mxu0 %v3274_v4  ;;  %v1519_v17 = vmul.f32 %v3225_v40, %v3596_v2 }
 0x2d2   :  { %v1498_v10 = vpop.xlane.xlu0 %1497  ;;  %v1495_v41 = vpop.xlane.xlu1 %1494 }
 0x2d3   :  { %3238 = vrcp.f32 %v1498_v10  ;;  %3081 = vmatmul.mubr.msk.f32.vlgmr.msra.gmra.mxu1 %vm1369_vm8, %v1519_v17 }
 0x2d4   :  { %v3227_v43 = vpop.eup %3226  ;;  %3240 = vrcp.f32 %v1495_v41  ;;  %3089 = vmatpush3.msra.mxu1 %v1550_v42  ;;  %3090 = vmatprep.mubr.msk.f32.mxu1 %vm3275_vm1, %v3274_v4 }
 0x2d5   :  { %v3229_v44 = vpop.eup %3228  ;;  %3098 = vmatprep.subr.mxu1 %v3274_v4  ;;  %v1523_v47 = vmul.f32 %v3227_v43, %v3600_v37 }
 0x2d6   :  { %v1504_v2 = vpop.xlane.xlu0 %1503  ;;  %v1501_v15 = vpop.xlane.xlu1 %1500  ;;  %v1521_v51 = vmul.f32 %v3229_v44, %v3604_v22 }
 0x2d7   :  { %3242 = vrcp.f32 %v1504_v2  ;;  %3091 = vmatmul.mubr.msk.f32.vlgmr.msra.gmra.mxu1 %vm1369_vm8, %v1523_v47 }
 0x2d8   :  { %v3231_v56 = vpop.eup %3230  ;;  %3244 = vrcp.f32 %v1501_v15  ;;  %3086 = vmatmul.mubr.msk.f32.vlgmr.msra.gmra.mxu0 %vm1369_vm8, %v1521_v51  ;;  %3099 = vmatpush3.msra.mxu1 %v1552_v52 }
 0x2d9   :  { %v3233_v34 = vpop.eup %3232  ;;  %3094 = vmatpush3.msra.mxu0 %v1551_v53  ;;  %3100 = vmatprep.mubr.msk.f32.mxu1 %vm3275_vm1, %v3274_v4  ;;  %v1527_v37 = vmul.f32 %v3231_v56, %v3610_v48  ;;  %v1553_v48 = vmul.f32 %v3452_v38, %v3504_v46  ;;  %v2758_v38 = vld [vmem:[%s3814_s2 + $0x70] sm:$0xff] }
 0x2da   :  { %3108 = vmatprep.subr.mxu1 %v3274_v4  ;;  %v1510_v22 = vpop.xlane.xlu0 %1509  ;;  %3095 = vmatprep.mubr.msk.f32.mxu0 %vm3275_vm1, %v3274_v4  ;;  %v1507_v61 = vpop.xlane.xlu1 %1506  ;;  %v1525_v62 = vmul.f32 %v3233_v34, %v3613_v28 }
 0x2db   :  { %3246 = vrcp.f32 %v1510_v22  ;;  %3103 = vmatprep.subr.mxu0 %v3274_v4  ;;  %3101 = vmatmul.mubr.msk.f32.vlgmr.msra.gmra.mxu1 %vm1369_vm8, %v1527_v37 }
 0x2dc   :  { %v3235_v3 = vpop.eup %3234  ;;  %3248 = vrcp.f32 %v1507_v61  ;;  %3096 = vmatmul.mubr.msk.f32.vlgmr.msra.gmra.mxu0 %vm1369_vm8, %v1525_v62  ;;  %3109 = vmatpush3.msra.mxu1 %v1554_v63 }
 0x2dd   :  { %v3237_v39 = vpop.eup %3236  ;;  %3104 = vmatpush3.msra.mxu0 %v1553_v48  ;;  %3105 = vmatprep.mubr.msk.f32.mxu0 %vm3275_vm1, %v3274_v4  ;;  %v1531_v18 = vmul.f32 %v3235_v3, %v3619_v57 }
 0x2de   :  { %3110 = vmatprep.mubr.msk.f32.mxu1 %vm3275_vm1, %v3274_v4  ;;  %3113 = vmatprep.subr.mxu0 %v3274_v4  ;;  %v1513_v28 = vpop.xlane.xlu1 %1512  ;;  %v1529_v46 = vmul.f32 %v3237_v39, %v3622_v58 }
 0x2df   :  { %3118 = vmatprep.subr.mxu1 %v3274_v4  ;;  %3250 = vrcp.f32 %v1513_v28  ;;  %3111 = vmatmul.mubr.msk.f32.vlgmr.msra.gmra.mxu1 %vm1369_vm8, %v1531_v18 }
 0x2e0   :  { %v3239_v57 = vpop.eup %3238  ;;  %3106 = vmatmul.mubr.msk.f32.vlgmr.msra.gmra.mxu0 %vm1369_vm8, %v1529_v46  ;;  %3119 = vmatpush3.msra.mxu1 %v1556_v6 }
 0x2e1   :  { %v3241_v11 = vpop.eup %3240  ;;  %3114 = vmatpush3.msra.mxu0 %v1555_v7  ;;  %3115 = vmatprep.mubr.msk.f32.mxu0 %vm3275_vm1, %v3274_v4  ;;  %v1535_v58 = vmul.f32 %v3239_v57, %v3628_v0 }
 0x2e2   :  { %3120 = vmatprep.mubr.msk.f32.mxu1 %vm3275_vm1, %v3274_v4  ;;  %3123 = vmatprep.subr.mxu0 %v3274_v4  ;;  %v1533_v29 = vmul.f32 %v3241_v11, %v3630_v49 }
 0x2e3   :  { %3128 = vmatprep.subr.mxu1 %v3274_v4  ;;  %3121 = vmatmul.mubr.msk.f32.vlgmr.msra.gmra.mxu1 %vm1369_vm8, %v1535_v58 }
 0x2e4   :  { %v3243_v12 = vpop.eup %3242  ;;  %3116 = vmatmul.mubr.msk.f32.vlgmr.msra.gmra.mxu0 %vm1369_vm8, %v1533_v29  ;;  %3129 = vmatpush3.msra.mxu1 %v1558_v24 }
 0x2e5   :  { %v3245_v0 = vpop.eup %3244  ;;  %3124 = vmatpush3.msra.mxu0 %v1557_v55  ;;  %3125 = vmatprep.mubr.msk.f32.mxu0 %vm3275_vm1, %v3274_v4  ;;  %v1539_v49 = vmul.f32 %v3243_v12, %v3636_v54 }
 0x2e6   :  { %3130 = vmatprep.mubr.msk.f32.mxu1 %vm3275_vm1, %v3274_v4  ;;  %3133 = vmatprep.subr.mxu0 %v3274_v4  ;;  %v1537_v19 = vmul.f32 %v3245_v0, %v3638_v5 }
 0x2e7   :  { %3138 = vmatprep.subr.mxu1 %v3274_v4  ;;  %3131 = vmatmul.mubr.msk.f32.vlgmr.msra.gmra.mxu1 %vm1369_vm8, %v1539_v49 }
 0x2e8   :  { %v3247_v16 = vpop.eup %3246  ;;  %3126 = vmatmul.mubr.msk.f32.vlgmr.msra.gmra.mxu0 %vm1369_vm8, %v1537_v19  ;;  %3139 = vmatpush3.msra.mxu1 %v1560_v32 }
 0x2e9   :  { %v3249_v54 = vpop.eup %3248  ;;  %3134 = vmatpush3.msra.mxu0 %v1559_v13  ;;  %3135 = vmatprep.mubr.msk.f32.mxu0 %vm3275_vm1, %v3274_v4  ;;  %v1543_v5 = vmul.f32 %v3247_v16, %v3644_v50 }
 0x2ea   :  { %3140 = vmatprep.mubr.msk.f32.mxu1 %vm3275_vm1, %v3274_v4  ;;  %3143 = vmatprep.subr.mxu0 %v3274_v4  ;;  %v1541_v25 = vmul.f32 %v3249_v54, %v3646_v59  ;;  %v2759_v59 = vld [vmem:[%s3814_s2 + $0x78] sm:$0xff] }
 0x2eb   :  { %3141 = vmatmul.mubr.msk.f32.vlgmr.msra.gmra.mxu1 %vm1369_vm8, %v1543_v5  ;;  %3148 = vmatprep.subr.mxu1 %v2759_v59 }
 0x2ec   :  { %v3251_v60 = vpop.eup %3250  ;;  %3136 = vmatmul.mubr.msk.f32.vlgmr.msra.gmra.mxu0 %vm1369_vm8, %v1541_v25  ;;  %3149 = vmatpush3.msra.mxu1 %v2759_v59 }
 0x2ed   :  { %3144 = vmatpush3.msra.mxu0 %v1561_v35  ;;  %3145 = vmatprep.mubr.msk.f32.mxu0 %vm3275_vm1, %v3274_v4  ;;  %v1545_v50 = vmul.f32 %v3251_v60, %v3652_v1  ;;  %v2756_v4 = vld [vmem:[%s3814_s2 + $0x60] sm:$0xff]  ;;  %v2755_v1 = vld [vmem:[%s3814_s2 + $0x58] sm:$0xff] }
 0x2ee   :  { %3150 = vmatprep.subr.mxu1 %v2758_v38  ;;  %v2888_v60 = vld [vmem:[%s3815_s3] ss:$0 sm:$0xff] }
 0x2ef   :  { %3151 = vmatpush3.msra.mxu1 %v2758_v38 }
 0x2f0   :  { %3146 = vmatmul.mubr.msk.f32.vlgmr.msra.gmra.mxu0 %vm1369_vm8, %v1545_v50  ;;  %3152 = vmatprep.subr.mxu1 %v2757_v45 }
 0x2f1   :  { %3153 = vmatpush3.msra.mxu1 %v2757_v45 }
 0x2f2   :  { %3154 = vmatprep.subr.mxu1 %v2756_v4 }
 0x2f3   :  { %3155 = vmatpush3.msra.mxu1 %v2756_v4 }
 0x2f4   :  { %3156 = vmatprep.subr.mxu1 %v2755_v1 }
 0x2f5   :  { %3157 = vmatpush3.msra.mxu1 %v2755_v1 }
 0x2f6   :  { %3158 = vmatprep.subr.mxu1 %v2754_v9 }
 0x2f7   :  { %3159 = vmatpush3.msra.mxu1 %v2754_v9 }
 0x2f8   :  { %3160 = vmatprep.subr.mxu1 %v2753_v20 }
 0x2f9   :  { %3161 = vmatpush3.msra.mxu1 %v2753_v20 }
 0x2fa   :  { %3162 = vmatprep.subr.mxu1 %v2752_v21 }
 0x2fb   :  { %3163 = vmatpush3.msra.mxu1 %v2752_v21 }
 0x2fc   :  { %3164 = vmatprep.subr.mxu1 %v2751_v23 }
 0x2fd   :  { %3165 = vmatpush3.msra.mxu1 %v2751_v23 }
 0x2fe   :  { %3166 = vmatprep.subr.mxu1 %v2750_v26 }
 0x2ff   :  { %3167 = vmatpush3.msra.mxu1 %v2750_v26 }
 0x300   :  { %3168 = vmatprep.subr.mxu1 %v2749_v27 }
 0x301   :  { %3169 = vmatpush3.msra.mxu1 %v2749_v27 }
 0x302   :  { %3170 = vmatprep.subr.mxu1 %v2748_v14 }
 0x303   :  { %3171 = vmatpush3.msra.mxu1 %v2748_v14 }
 0x304   :  { %3172 = vmatprep.subr.mxu1 %v2747_v30 }
 0x305   :  { %3173 = vmatpush3.msra.mxu1 %v2747_v30 }
 0x306   :  { %3174 = vmatprep.subr.mxu1 %v2746_v31 }
 0x307   :  { %3175 = vmatpush3.msra.mxu1 %v2746_v31 }
 0x308   :  { %3176 = vmatprep.subr.mxu1 %v2745_v8 }
 0x309   :  { %3177 = vmatpush3.msra.mxu1 %v2745_v8 }
 0x30a   :  { %3178 = vmatprep.subr.mxu1 %v2744_v33 }
 0x30b   :  { %3179 = vmatpush3.msra.mxu1 %v2744_v33 }
 0x38b   :  { %v1631_v36 = vpop.f32.mrf.mxu1 }
 0x38d   :  { %v3072_v40 = vpop.f32.mrf.mxu1 }
 0x38f   :  { %v1704_v17 = vpop.f32.mrf.mxu0 }
 0x390   :  { %v2730_v42 = vadd.f32 %v1704_v17, %v1631_v36 }
 0x391   :  { %v3077_v10 = vpop.f32.mrf.mxu0 }
 0x393   :  { %v1777_v41 = vpop.f32.mrf.mxu1 }
 0x394   :  { %v2731_v44 = vadd.f32 %v2730_v42, %v1777_v41 }
 0x395   :  { %v3082_v43 = vpop.f32.mrf.mxu1 }
 0x397   :  { %v1923_v47 = vpop.f32.mrf.mxu1 }
 0x398   :  { %v1850_v2 = vpop.f32.mrf.mxu0 }
 0x399   :  { %v2732_v15 = vadd.f32 %v2731_v44, %v1850_v2  ;;  %v3092_v51 = vpop.f32.mrf.mxu1 }
 0x39a   :  { %v3087_v52 = vpop.f32.mrf.mxu0 }
 0x39b   :  { %v2733_v53 = vadd.f32 %v2732_v15, %v1923_v47  ;;  %v2069_v56 = vpop.f32.mrf.mxu1 }
 0x39c   :  { %v1996_v34 = vpop.f32.mrf.mxu0 }
 0x39d   :  { %v2734_v37 = vadd.f32 %v2733_v53, %v1996_v34  ;;  %v3102_v22 = vpop.f32.mrf.mxu1 }
 0x39e   :  { %v3097_v61 = vpop.f32.mrf.mxu0 }
 0x39f   :  { %v2735_v62 = vadd.f32 %v2734_v37, %v2069_v56  ;;  %v2215_v63 = vpop.f32.mrf.mxu1 }
 0x3a0   :  { %v2142_v48 = vpop.f32.mrf.mxu0 }
 0x3a1   :  { %v2736_v3 = vadd.f32 %v2735_v62, %v2142_v48  ;;  %v3112_v39 = vpop.f32.mrf.mxu1 }
 0x3a2   :  { %v3107_v18 = vpop.f32.mrf.mxu0 }
 0x3a3   :  { %3180 = vmatprep.mubr.f32.mxu1 %v2736_v3  ;;  %v2361_v28 = vpop.f32.mrf.mxu1 }
 0x3a4   :  { %v2288_v46 = vpop.f32.mrf.mxu0 }
 0x3a5   :  { %v2737_v6 = vadd.f32 %v2288_v46, %v2215_v63  ;;  %v3122_v7 = vpop.f32.mrf.mxu1 }
 0x3a6   :  { %v3117_v57 = vpop.f32.mrf.mxu0 }
 0x3a7   :  { %v2738_v11 = vadd.f32 %v2737_v6, %v2361_v28  ;;  %v2507_v58 = vpop.f32.mrf.mxu1 }
 0x3a8   :  { %v2434_v29 = vpop.f32.mrf.mxu0 }
 0x3a9   :  { %v2739_v24 = vadd.f32 %v2738_v11, %v2434_v29  ;;  %v3132_v55 = vpop.f32.mrf.mxu1 }
 0x3aa   :  { %v3127_v12 = vpop.f32.mrf.mxu0 }
 0x3ab   :  { %v2740_v0 = vadd.f32 %v2739_v24, %v2507_v58  ;;  %v2653_v49 = vpop.f32.mrf.mxu1 }
 0x3ac   :  { %v2580_v19 = vpop.f32.mrf.mxu0 }
 0x3ad   :  { %v2741_v32 = vadd.f32 %v2740_v0, %v2580_v19  ;;  %v3142_v13 = vpop.f32.mrf.mxu1 }
 0x3ae   :  { %v3137_v16 = vpop.f32.mrf.mxu0 }
 0x3af   :  { %v2742_v54 = vadd.f32 %v2741_v32, %v2653_v49 }
 0x3b0   :  { %v2726_v5 = vpop.f32.mrf.mxu0 }
 0x3b1   :  { %v2743_v25 = vadd.f32 %v2742_v54, %v2726_v5 }
 0x3b2   :  { %v3147_v35 = vpop.f32.mrf.mxu0 }
 0x3b3   :  { %3181 = vmatmul.mubr.f32.vlgmr.msra.gmra.mxu1 %v2743_v25 }
 0x473   :  { %v3182_v50 = vpop.f32.mrf.mxu1 }
 0x474   :  { %v2839_v59 = vadd.f32 %v3182_v50, %v2888_v60 }
 0x475   :  { %v2833_v38 = vpop.f32.mrf.mxu1 }
 0x476   :  { %2843 = vst.msk [vmem:[#allocation2 + $0x8] sm:$0xff] %vm32_vm0, %v2839_v59  ;;  %v2834_v45 = vadd.f32 %v2888_v60, %v2833_v38 }
 0x478   :  { %2842 = vst.msk [vmem:[#allocation2] sm:$0xff] %vm32_vm0, %v2834_v45 }
 0x479   :  { %3263 = shalt.err (!%p3260_p4)
}
 0x47a   :  { %s3277_s23 = smov 128   ;;  %s3278_s3 = smov 8  }
 0x47b   :  { %2855 = dma.vmem_to_hbm [thread:$0]  %s2850_s21, 256, %s3816_s4, [#allocation3], %s3277_s23, %s3277_s23, %s3278_s3  }
 0x47c   :  { %3272 = dma.done.wait [#allocation3], 256  }
 0x47d   :  { %3273 = vsyncadd [#allocation3], 4294967040 }
 0x47e   :  { %2859 = vsyncpa [#allocation3], 1 }

</bundles_post_ra>
